<compile_context>
chip_gen: v6e
topology: v6e:2x2x1
jax: 0.10.0
libtpu: 0.0.40
codegen_flags: <defaults>
</compile_context>

<pallas_src>
import functools

import jax
import jax.numpy as jnp
from jax.experimental import pallas as pl
from jax.experimental.pallas import tpu as pltpu


_LANES = 128            # points per folded row (lane width of the weight view)
_ROW_PTS = 8 * _LANES   # pad granularity: keeps the folded row count a multiple of 8


def _wnl_kernel(e_ref, w_ref, d_ref, p_ref, o_ref, acc_ref, *,
                inner, tm, n_rows, full_blocks, needs_mask):
    j = pl.program_id(0)
    i = pl.program_id(1)

    @pl.when(i == 0)
    def _init():
        acc_ref[...] = jnp.zeros_like(acc_ref)

    # Cast to f32 after the load (inputs may be bf16); all accumulation in f32.
    w = w_ref[...].astype(jnp.float32)          # (tm, 128)
    d = d_ref[...].astype(jnp.float32)          # (tm, C*128)
    p = p_ref[...].astype(jnp.float32)          # (tm, C*128)

    # Expand each weight lane to its C interleaved component lanes on the (idle) MXU:
    # E[k, l] == 1 iff l // C == k, so w_exp[r, l] = w[r, l // C].  HIGHEST precision keeps
    # the f32 weights exact; the matmul is hidden under the block's HBM DMA.
    w_exp = jnp.dot(w, e_ref[...],
                    preferred_element_type=jnp.float32,
                    precision=jax.lax.Precision.HIGHEST)       # (tm, C*128)

    # Single fused accumulator update: lanes [0, C*128) hold sum(w*d*p) partials,
    # lanes [C*128, (C+1)*128) hold sum(w) partials.
    upd = jnp.concatenate([w_exp * d * p, w], axis=1)           # (tm, (C+1)*128)

    blk = j * inner + i
    if needs_mask:
        # Interior blocks: mask-free fast path.
        @pl.when(blk < full_blocks)
        def _fast():
            acc_ref[...] += upd

        # Edge / clamped duplicate blocks: zero rows whose global row index is out of range.
        # (Keeps NaN-safety: we *select*, never multiply, the garbage edge rows away.)
        @pl.when(blk >= full_blocks)
        def _masked():
            rows = blk * tm + jax.lax.broadcasted_iota(jnp.int32, (tm, 1), 0)
            acc_ref[...] += jnp.where(rows < n_rows, upd, 0.0)
    else:
        acc_ref[...] += upd

    @pl.when(i == pl.num_programs(1) - 1)
    def _flush():
        # Fold the (tm, Wa) accumulator to a tiny (8, Wa) output (writeback does not scale
        # with the tile size).  fori_loop keeps the live-register footprint bounded.
        wa = acc_ref.shape[1]

        def body(t, carry):
            start = pl.multiple_of(t * 8, 8)
            return carry + acc_ref[pl.ds(start, 8), :]

        o_ref[...] = jax.lax.fori_loop(0, tm // 8, body,
                                       jnp.zeros((8, wa), jnp.float32))


def _device_kind():
    try:
        return jax.devices()[0].device_kind.lower()
    except Exception:
        return ""


def _default_n_split():
    # Devices whose TensorCores are driven as one JAX device (megacore v4/v5p, v7x) benefit
    # from a 2-way "parallel" leading grid axis; single-TC chips (v5e/v6e) should not pay the
    # duplicated-block / masking overhead.
    kind = _device_kind()
    return 2 if any(tag in kind for tag in ("v4", "v5p", "v7", "7x")) else 1


def weighted_normal_loss(weight, d_norm, p_norm, size_average=False, *,
                         block_rows=1024, n_split=None):
    """Pallas TPU forward of WeightedNormalLoss.

    weight: (..., N); d_norm / p_norm: (..., N, C).  Returns a float32 scalar.
    block_rows: rows of 128 points processed per grid step (multiple of 8).
    """
    C = d_norm.shape[-1]
    assert p_norm.shape == d_norm.shape
    M = weight.size                      # total number of points (flattened batch)
    assert d_norm.size == M * C

    Lw = _LANES
    wf = weight.reshape(-1)
    df = d_norm.reshape(-1, C)
    pf = p_norm.reshape(-1, C)

    # Pad the point count to a multiple of 8*128 so the folded views below are pure row-major
    # reshapes (no transpose, no copy).  Zero-padded points contribute exactly 0.
    Mp = ((M + _ROW_PTS - 1) // _ROW_PTS) * _ROW_PTS
    if Mp != M:
        pad = Mp - M
        wf = jnp.pad(wf, (0, pad))
        df = jnp.pad(df, ((0, pad), (0, 0)))
        pf = jnp.pad(pf, ((0, pad), (0, 0)))

    R = Mp // Lw                          # folded rows (multiple of 8)
    w2 = wf.reshape(R, Lw)                # (R, 128):    (a, k)      -> point a*128 + k
    d2 = df.reshape(R, C * Lw)            # (R, C*128):  (a, l)      -> point a*128 + l//C, comp l%C
    p2 = pf.reshape(R, C * Lw)

    # Constant lane-expansion matrix E[k, l] = 1 iff l // C == k (tiny, DMA'd once).
    lane = jnp.arange(C * Lw, dtype=jnp.int32)[None, :]
    sub = jnp.arange(Lw, dtype=jnp.int32)[:, None]
    expand = (lane // C == sub).astype(jnp.float32)        # (128, C*128)

    # Row-block size (multiple of 8, clamped for small inputs).
    tm = max(8, (int(block_rows) // 8) * 8)
    if tm >= R:
        tm = R
    nb = pl.cdiv(R, tm)

    if n_split is None:
        n_split = _default_n_split()
    n_split = max(1, min(int(n_split), nb))
    inner = pl.cdiv(nb, n_split)

    full_blocks = R // tm
    needs_mask = (R % tm != 0) or (n_split * inner != nb)

    if n_split * inner == nb:
        row_map = lambda j, i: (j * inner + i, 0)
    else:
        # Clamp logically-out-of-range blocks onto the last valid block; their contribution is
        # fully masked inside the kernel.
        row_map = lambda j, i: (jnp.minimum(j * inner + i, nb - 1), 0)

    Wa = (C + 1) * Lw
    kernel = functools.partial(_wnl_kernel, inner=inner, tm=tm, n_rows=R,
                               full_blocks=full_blocks, needs_mask=needs_mask)

    # VMEM budget: inputs double-buffered + accumulator + a few full-width temporaries.
    # Only raise the scoped limit when the requested tile would not fit under the defaults.
    bytes_in = 2 * (2 * tm * C * Lw * d2.dtype.itemsize
                    + tm * Lw * w2.dtype.itemsize
                    + expand.size * 4)
    bytes_acc = tm * Wa * 4
    bytes_tmp = 3 * tm * Wa * 4
    bytes_out = 2 * 8 * Wa * 4
    need = bytes_in + bytes_acc + bytes_tmp + bytes_out
    cp = dict(dimension_semantics=("parallel", "arbitrary"))
    if need > 10 * 1024 * 1024:
        cap = (48 if "7" in _device_kind() else 96) * 1024 * 1024
        cp["vmem_limit_bytes"] = min(int(need * 1.3) + (2 << 20), cap)

    out = pl.pallas_call(
        kernel,
        out_shape=jax.ShapeDtypeStruct((n_split * 8, Wa), jnp.float32),
        grid_spec=pltpu.PrefetchScalarGridSpec(
            num_scalar_prefetch=0,
            grid=(n_split, inner),
            in_specs=[
                pl.BlockSpec((Lw, C * Lw), lambda j, i: (0, 0)),   # expansion matrix (resident)
                pl.BlockSpec((tm, Lw), row_map),                   # weight rows
                pl.BlockSpec((tm, C * Lw), row_map),               # d_norm rows
                pl.BlockSpec((tm, C * Lw), row_map),               # p_norm rows
            ],
            out_specs=pl.BlockSpec((8, Wa), lambda j, i: (j, 0)),
            scratch_shapes=[pltpu.VMEM((tm, Wa), jnp.float32)],
        ),
        compiler_params=pltpu.CompilerParams(**cp),
    )(expand, w2, d2, p2)

    # Tiny epilogue: loss = sum(w) - sum(w*d*p).
    loss = jnp.sum(out[:, C * Lw:]) - jnp.sum(out[:, :C * Lw])
    if size_average:
        loss = loss / jnp.float32(M)      # torch.mean over all point-wise terms
    return loss


if __name__ == "__main__":
    key = jax.random.PRNGKey(0)
    kw, kd, kp = jax.random.split(key, 3)

    def make_inputs(B, N, C):
        w = jax.random.uniform(kw, (B, N), dtype=jnp.float32)
        d = jax.random.normal(kd, (B, N, C), dtype=jnp.float32)
        p = jax.random.normal(kp, (B, N, C), dtype=jnp.float32)
        d = d / jnp.linalg.norm(d, axis=-1, keepdims=True)
        p = p / jnp.linalg.norm(p, axis=-1, keepdims=True)
        return w, d, p

    def ref_loss(w, d, p, size_average):
        dot_diff = 1.0 - jnp.sum(d * p, axis=-1)
        return jnp.mean(w * dot_diff) if size_average else jnp.sum(w * dot_diff)

    # Case 1: point count divisible by 1024 -> pure free-reshape path (no wrapper copies).
    w, d, p = make_inputs(2, 512, 3)
    out = jax.block_until_ready(weighted_normal_loss(w, d, p, size_average=False))
    ref = ref_loss(w, d, p, False)
    assert jnp.allclose(out, ref, rtol=1e-4, atol=1e-4), (out, ref)

    out_avg = jax.block_until_ready(weighted_normal_loss(w, d, p, size_average=True))
    ref_avg = ref_loss(w, d, p, True)
    assert jnp.allclose(out_avg, ref_avg, rtol=1e-4, atol=1e-4), (out_avg, ref_avg)

    # Case 2: ragged point count + multi-block grid + 2-way split (exercises the zero-pad path,
    # the gated edge-block masking and clamped duplicate blocks).
    w3, d3, p3 = make_inputs(2, 2500, 3)
    out3 = jax.block_until_ready(
        weighted_normal_loss(w3, d3, p3, size_average=False, block_rows=16, n_split=2))
    ref3 = ref_loss(w3, d3, p3, False)
    assert jnp.allclose(out3, ref3, rtol=1e-4, atol=1e-4), (out3, ref3)

    print("KERNEL_OK")
</pallas_src>

<mosaic_0001>
module attributes {stable_mosaic.version = 11 : i64} {
  func.func @_wnl_kernel(%arg0: i32, %arg1: i32, %arg2: memref<128x384xf32, #tpu.memory_space<vmem>>, %arg3: memref<8x128xf32, #tpu.memory_space<vmem>>, %arg4: memref<8x384xf32, #tpu.memory_space<vmem>>, %arg5: memref<8x384xf32, #tpu.memory_space<vmem>>, %arg6: memref<8x512xf32, #tpu.memory_space<vmem>>, %arg7: memref<8x512xf32, #tpu.memory_space<vmem>>) attributes {dimension_semantics = [#tpu.dimension_semantics<parallel>, #tpu.dimension_semantics<arbitrary>], iteration_bounds = array<i64: 1, 1>, scalar_prefetch = 0 : i64, scratch_operands = 1 : i64, tpu.core_type = #tpu.core_type<tc>, window_params = [{pipeline_mode = #tpu.pipeline_mode<synchronous>, transform_indices = @transform_0, window_bounds = array<i64: 128, 384>}, {transform_indices = @transform_1, window_bounds = array<i64: 8, 128>}, {transform_indices = @transform_2, window_bounds = array<i64: 8, 384>}, {transform_indices = @transform_3, window_bounds = array<i64: 8, 384>}, {transform_indices = @transform_4, window_bounds = array<i64: 8, 512>}]} {
    %c0_i32 = arith.constant 0 : i32
    %0 = arith.cmpi eq, %arg1, %c0_i32 : i32
    %1 = arith.extui %0 : i1 to i32
    %c0_i32_0 = arith.constant 0 : i32
    %2 = arith.cmpi ne, %1, %c0_i32_0 : i32
    scf.if %2 {
      %cst_14 = arith.constant 0.000000e+00 : f32
      %17 = vector.broadcast %cst_14 : f32 to vector<8x512xf32>
      %c0_15 = arith.constant 0 : index
      %c0_16 = arith.constant 0 : index
      %18 = vector.load %arg7[%c0_15, %c0_16] : memref<8x512xf32, #tpu.memory_space<vmem>>, vector<8x512xf32>
      tpu.vector_store %arg7[%c0_15, %c0_16], %17 {strides = array<i32>} : memref<8x512xf32, #tpu.memory_space<vmem>>, vector<8x512xf32>,
    } else {
    }
    %c0 = arith.constant 0 : index
    %c0_1 = arith.constant 0 : index
    %3 = vector.load %arg3[%c0, %c0_1] : memref<8x128xf32, #tpu.memory_space<vmem>>, vector<8x128xf32>
    %c0_2 = arith.constant 0 : index
    %c0_3 = arith.constant 0 : index
    %4 = vector.load %arg4[%c0_2, %c0_3] : memref<8x384xf32, #tpu.memory_space<vmem>>, vector<8x384xf32>
    %c0_4 = arith.constant 0 : index
    %c0_5 = arith.constant 0 : index
    %5 = vector.load %arg5[%c0_4, %c0_5] : memref<8x384xf32, #tpu.memory_space<vmem>>, vector<8x384xf32>
    %c0_6 = arith.constant 0 : index
    %c0_7 = arith.constant 0 : index
    %6 = vector.load %arg2[%c0_6, %c0_7] : memref<128x384xf32, #tpu.memory_space<vmem>>, vector<128x384xf32>
    %cst = arith.constant dense<0.000000e+00> : vector<8x384xf32>
    %7 = tpu.matmul %3, %6, %cst {dimension_numbers = #tpu.dot_dimension_numbers<[1], [0], [0], [1], [0, 0, 1, 1], [], []>, precision = #tpu.contract_precision<fp32>} : vector<8x128xf32>, vector<128x384xf32>, vector<8x384xf32> -> vector<8x384xf32>
    %8 = arith.mulf %7, %4 : vector<8x384xf32>
    %9 = arith.mulf %8, %5 : vector<8x384xf32>
    %10 = tpu.concatenate %9, %3 in 1 : vector<8x384xf32>, vector<8x128xf32> -> vector<8x512xf32>
    %c0_8 = arith.constant 0 : index
    %c0_9 = arith.constant 0 : index
    %11 = vector.load %arg7[%c0_8, %c0_9] : memref<8x512xf32, #tpu.memory_space<vmem>>, vector<8x512xf32>
    %12 = arith.addf %11, %10 : vector<8x512xf32>
    %c0_10 = arith.constant 0 : index
    %c0_11 = arith.constant 0 : index
    %13 = vector.load %arg7[%c0_10, %c0_11] : memref<8x512xf32, #tpu.memory_space<vmem>>, vector<8x512xf32>
    tpu.vector_store %arg7[%c0_10, %c0_11], %12 {strides = array<i32>} : memref<8x512xf32, #tpu.memory_space<vmem>>, vector<8x512xf32>,
    %c0_i32_12 = arith.constant 0 : i32
    %14 = arith.cmpi eq, %arg1, %c0_i32_12 : i32
    %15 = arith.extui %14 : i1 to i32
    %c0_i32_13 = arith.constant 0 : i32
    %16 = arith.cmpi ne, %15, %c0_i32_13 : i32
    scf.if %16 {
      %cst_14 = arith.constant 0.000000e+00 : f32
      %17 = vector.broadcast %cst_14 : f32 to vector<8x512xf32>
      %c0_i32_15 = arith.constant 0 : i32
      %c8_i32 = arith.constant 8 : i32
      %18 = arith.muli %c0_i32_15, %c8_i32 : i32
      %19 = tpu.assume_multiple %18, 8 : i32
      %20 = arith.index_cast %19 : i32 to index
      %c0_16 = arith.constant 0 : index
      %21 = vector.load %arg7[%20, %c0_16] : memref<8x512xf32, #tpu.memory_space<vmem>>, vector<8x512xf32>
      %22 = arith.addf %17, %21 : vector<8x512xf32>
      %c1_i32 = arith.constant 1 : i32
      %c0_17 = arith.constant 0 : index
      %c0_18 = arith.constant 0 : index
      %23 = vector.load %arg6[%c0_17, %c0_18] : memref<8x512xf32, #tpu.memory_space<vmem>>, vector<8x512xf32>
      tpu.vector_store %arg6[%c0_17, %c0_18], %22 {strides = array<i32>} : memref<8x512xf32, #tpu.memory_space<vmem>>, vector<8x512xf32>,
    } else {
    }
    return
  }
  func.func @transform_0(%arg0: i32, %arg1: i32) -> (i32, i32) {
    %c0_i32 = arith.constant 0 : i32
    %c0_i32_0 = arith.constant 0 : i32
    %c0_i32_1 = arith.constant 0 : i32
    return %c0_i32, %c0_i32_0 : i32, i32
  }
  func.func @transform_1(%arg0: i32, %arg1: i32) -> (i32, i32) {
    %c1_i32 = arith.constant 1 : i32
    %0 = arith.muli %arg0, %c1_i32 : i32
    %1 = arith.addi %0, %arg1 : i32
    %c0_i32 = arith.constant 0 : i32
    %c0_i32_0 = arith.constant 0 : i32
    return %1, %c0_i32 : i32, i32
  }
  func.func @transform_2(%arg0: i32, %arg1: i32) -> (i32, i32) {
    %c1_i32 = arith.constant 1 : i32
    %0 = arith.muli %arg0, %c1_i32 : i32
    %1 = arith.addi %0, %arg1 : i32
    %c0_i32 = arith.constant 0 : i32
    %c0_i32_0 = arith.constant 0 : i32
    return %1, %c0_i32 : i32, i32
  }
  func.func @transform_3(%arg0: i32, %arg1: i32) -> (i32, i32) {
    %c1_i32 = arith.constant 1 : i32
    %0 = arith.muli %arg0, %c1_i32 : i32
    %1 = arith.addi %0, %arg1 : i32
    %c0_i32 = arith.constant 0 : i32
    %c0_i32_0 = arith.constant 0 : i32
    return %1, %c0_i32 : i32, i32
  }
  func.func @transform_4(%arg0: i32, %arg1: i32) -> (i32, i32) {
    %c0_i32 = arith.constant 0 : i32
    %c0_i32_0 = arith.constant 0 : i32
    return %arg0, %c0_i32 : i32, i32
  }
}

</mosaic_0001>

<bundles_post_ra>
// kernel: tpu_custom_call.1
= control target key start
LH: loop header
LB: loop body
LE: loop exit
PB: predicated region body
PF: predicated region fallthrough
CT: control target
= control target key end

     0   :  { %9 = vsyncpa [#allocation4], 0  ;;  %s3130_s0 = inlined_call_operand.hbm [shape: f32[128,384], index: 0, kind: input, shape index: {}]   ;;  %s3131_s1 = inlined_call_operand.hbm [shape: f32[8,128], index: 1, kind: input, shape index: {}]   ;;  %s3132_s2 = inlined_call_operand.hbm [shape: f32[8,384], index: 2, kind: input, shape index: {}]   ;;  %s3133_s3 = inlined_call_operand.hbm [shape: f32[8,384], index: 3, kind: input, shape index: {}]   ;;  %s3134_s4 = inlined_call_operand.hbm [shape: f32[8,512], index: 4, kind: output, shape index: {}]  }
   0x1   :  { %10 = vsyncpa [#allocation7], 0 }
   0x2   :  { %11 = vsyncpa [#allocation10], 0 }
   0x3   :  { %12 = vsyncpa [#allocation5], 0  ;;  %s2122_s15 = smov [#allocation6]   ;;  %s2123_s17 = smov [#allocation3]  }
   0x4   :  { %s34_s16 = sshll.u32 %s2122_s15, 4  ;;  %s18_s18 = sshll.u32 %s2123_s17, 4  ;;  %s35_s16 = int_to_ptr.vmem [resolvable:$true] %s34_s16  ;;  %s19_s18 = int_to_ptr.vmem [resolvable:$true] %s18_s18 }
   0x5   :  { %s2022_s19 = scalar_lea.vmem %s35_s16, 128  ;;  %p2027_p1 = scmp.lt.s32.totalorder %s35_s16, %s35_s16 }
   0x6   :  { %p2023_p0 = scmp.ne.s32.totalorder %s35_s16, %s2022_s19  ;;  %p2028_p2 = scmp.lt.s32.totalorder %s2022_s19, %s2022_s19 }
   0x8   :  { %p2029_p3 = por %p2028_p2, %p2027_p1 }
   0xa   :  { %p2030_p4 = pnand %p2029_p3, %p2023_p0 }
   0xc   :  { %2033 = shalt.err (!%p2030_p4)
}
   0xd   :  { %37 = dma.hbm_to_vmem [thread:$0]  %s3131_s1, 128, %s35_s16, [#allocation7]  }
   0xe   :  { %s2042_s22 = scalar_lea.vmem %s19_s18, 6144  ;;  %p2047_p6 = scmp.lt.s32.totalorder %s19_s18, %s19_s18 }
   0xf   :  { %p2043_p5 = scmp.ne.s32.totalorder %s19_s18, %s2042_s22  ;;  %p2048_p7 = scmp.lt.s32.totalorder %s2042_s22, %s2042_s22 }
  0x11   :  { %p2049_p8 = por %p2048_p7, %p2047_p6 }
  0x13   :  { %p2050_p9 = pnand %p2049_p8, %p2043_p5 }
  0x15   :  { %2053 = shalt.err (!%p2050_p9)
}
  0x16   :  { %s2124_s23 = smov 384   ;;  %s2125_s24 = smov 24  }
  0x17   :  { %24 = dma.hbm_to_vmem [thread:$0]  %s3130_s0, 6144, %s19_s18, [#allocation4], %s2124_s23, %s2124_s23, %s2125_s24  }
  0x18   :  { %s2126_s27 = smov [#allocation8]   ;;  %s2127_s29 = smov [#allocation9]  }
  0x19   :  { %s48_s28 = sshll.u32 %s2126_s27, 4  ;;  %s62_s30 = sshll.u32 %s2127_s29, 4  ;;  %s49_s28 = int_to_ptr.vmem [resolvable:$true] %s48_s28  ;;  %s63_s30 = int_to_ptr.vmem [resolvable:$true] %s62_s30 }
  0x1a   :  { %s2062_s1 = scalar_lea.vmem %s49_s28, 384  ;;  %p2067_p11 = scmp.lt.s32.totalorder %s49_s28, %s49_s28 }
  0x1b   :  { %p2063_p10 = scmp.ne.s32.totalorder %s49_s28, %s2062_s1  ;;  %p2068_p12 = scmp.lt.s32.totalorder %s2062_s1, %s2062_s1 }
  0x1d   :  { %p2069_p13 = por %p2068_p12, %p2067_p11 }
  0x1f   :  { %p2070_p0 = pnand %p2069_p13, %p2063_p10 }
  0x21   :  { %2073 = shalt.err (!%p2070_p0)
}
  0x22   :  { %51 = dma.hbm_to_vmem [thread:$0]  %s3132_s2, 384, %s49_s28, [#allocation7]  }
  0x23   :  { %s2082_s7 = scalar_lea.vmem %s63_s30, 384  ;;  %p2087_p2 = scmp.lt.s32.totalorder %s63_s30, %s63_s30 }
  0x24   :  { %p2083_p1 = scmp.ne.s32.totalorder %s63_s30, %s2082_s7  ;;  %p2088_p3 = scmp.lt.s32.totalorder %s2082_s7, %s2082_s7 }
  0x26   :  { %p2089_p4 = por %p2088_p3, %p2087_p2 }
  0x28   :  { %p2090_p5 = pnand %p2089_p4, %p2083_p1 }
  0x2a   :  { %2093 = shalt.err (!%p2090_p5)
}
  0x2b   :  { %65 = dma.hbm_to_vmem [thread:$0]  %s3133_s3, 384, %s63_s30, [#allocation10]  }
  0x2c   :  { %2114 = dma.done.wait [#allocation4], 6144  }
  0x2d   :  { %2115 = vsyncadd [#allocation4], 4294961152 }
  0x2e   :  { %2116 = dma.done.wait [#allocation7], 512  }
  0x2f   :  { %2117 = vsyncadd [#allocation7], 4294966784 }
  0x30   :  { %2118 = dma.done.wait [#allocation10], 384  }
  0x31   :  { %2119 = vsyncadd [#allocation10], 4294966912  ;;  %v3148_v0 = vmov 0.0   ;;  %v142_v1 = vld [vmem:[#allocation3 + $0x170] sm:$0xff]  ;;  %v141_v2 = vld [vmem:[#allocation3 + $0x168] sm:$0xff]  ;;  %vm2129_vm0 = vmmov 0  }
  0x32   :  { %240 = vmatprep.mubr.f32.mxu0 %v3148_v0  ;;  %476 = vmatprep.mubr.f32.mxu1 %v3148_v0  ;;  %v139_v3 = vld [vmem:[#allocation3 + $0x158] sm:$0xff]  ;;  %v2170_v4 = vand.u32 4294901760, %v142_v1  ;;  %v2172_v5 = vand.u32 4294901760, %v141_v2  ;;  %v138_v7 = vld [vmem:[#allocation3 + $0x150] sm:$0xff]  ;;  %v136_v8 = vld [vmem:[#allocation3 + $0x140] sm:$0xff]  ;;  %s2130_s2 = smov [#allocation11]  }
  0x33   :  { %v2174_v6 = vand.u32 4294901760, %v139_v3  ;;  %v135_v9 = vld [vmem:[#allocation3 + $0x138] sm:$0xff]  ;;  %v2176_v10 = vand.u32 4294901760, %v138_v7  ;;  %v2178_v11 = vand.u32 4294901760, %v136_v8  ;;  %v133_v13 = vld [vmem:[#allocation3 + $0x128] sm:$0xff]  ;;  %v132_v14 = vld [vmem:[#allocation3 + $0x120] sm:$0xff] }
  0x34   :  { %v2180_v12 = vand.u32 4294901760, %v135_v9  ;;  %v2182_v15 = vld [vmem:[#allocation3 + $0x110] sm:$0xff]  ;;  %145 = vmatprep.subr.mxu0 %v2170_v4  ;;  %v2185_v16 = vand.u32 4294901760, %v133_v13  ;;  %v2187_v17 = vand.u32 4294901760, %v132_v14  ;;  %v2193_v19 = vsub.f32 %v142_v1, %v2170_v4  ;;  %v2195_v20 = vld [vmem:[#allocation3 + $0x108] sm:$0xff]  ;;  %v2197_v21 = vld [vmem:[#allocation3 + $0xf8] sm:$0xff] }
  0x35   :  { %v2190_v18 = vand.u32 4294901760, %v2182_v15  ;;  %v2199_v22 = vld [vmem:[#allocation3 + $0xf0] sm:$0xff]  ;;  %147 = vmatpush1.msra.mxu0 %v2172_v5  ;;  %v2203_v23 = vand.u32 4294901760, %v2195_v20  ;;  %v2206_v24 = vsub.f32 %v141_v2, %v2172_v5  ;;  %v2209_v25 = vand.u32 4294901760, %v2197_v21  ;;  %v2214_v27 = vld [vmem:[#allocation3 + $0xe0] sm:$0xff]  ;;  %v2216_v28 = vld [vmem:[#allocation3 + $0xd8] sm:$0xff] }
  0x36   :  { %v2212_v26 = vsub.f32 %v139_v3, %v2174_v6  ;;  %v2218_v29 = vld [vmem:[#allocation3 + $0xc8] sm:$0xff]  ;;  %149 = vmatprep.subr.mxu0 %v2174_v6  ;;  %v3147_v30 = vand.u32 4294901760, %v2193_v19  ;;  %v2223_v31 = vand.u32 4294901760, %v2199_v22  ;;  %v2226_v32 = vsub.f32 %v138_v7, %v2176_v10  ;;  %v2240_v38 = vld [vmem:[#allocation3 + $0xc0] sm:$0xff]  ;;  %v2264_v47 = vld [vmem:[#allocation3 + $0xb0] sm:$0xff]  ;;  %s1682_s3 = sshll.u32 %s2130_s2, 4  ;;  %s1683_s3 = int_to_ptr.vmem [resolvable:$true] %s1682_s3 }
  0x37   :  { %v2229_v33 = vand.u32 4294901760, %v2214_v27  ;;  %151 = vmatpush1.msra.mxu0 %v2176_v10  ;;  %v3145_v34 = vand.u32 4294901760, %v2206_v24  ;;  %v2235_v36 = vsub.f32 %v136_v8, %v2178_v11  ;;  %v2238_v37 = vand.u32 4294901760, %v2216_v28  ;;  %v2274_v52 = vld [vmem:[#allocation3 + $0xa8] sm:$0xff]  ;;  %v2281_v57 = vld [vmem:[#allocation3 + $0x98] sm:$0xff]  ;;  %v2283_v58 = vld [vmem:[#allocation6] sm:$0xff]  ;;  %p2099_p7 = scmp.lt.s32.totalorder %s1683_s3, %s1683_s3 }
  0x38   :  { %3203 = vst [vmem:[#allocation16_spill] sm:$0xff] %v2223_v31  ;;  %v3143_v35 = vand.u32 4294901760, %v2212_v26  ;;  %153 = vmatprep.subr.mxu0 %v2178_v11  ;;  %v255_v39 = vsub.f32 %v2193_v19, %v3147_v30  ;;  %v3142_v40 = vand.u32 4294901760, %v2226_v32  ;;  %v2248_v41 = vsub.f32 %v135_v9, %v2180_v12  ;;  %v2295_v63 = vld [vmem:[#allocation3 + $0x90] sm:$0xff]  ;;  %1675 = vst [vmem:[#allocation11 + $0x18] sm:$0xff] %v2283_v58  ;;  %v2309_v8 = vld [vmem:[#allocation3 + $0x80] sm:$0xff] }
  0x39   :  { %3204 = vst [vmem:[#allocation17_spill] sm:$0xff] %v2229_v33  ;;  %3205 = vst [vmem:[#allocation18_spill] sm:$0xff] %v2238_v37  ;;  %v2251_v42 = vand.u32 4294901760, %v2218_v29  ;;  %155 = vmatpush1.msra.mxu0 %v2180_v12  ;;  %v261_v43 = vsub.f32 %v2206_v24, %v3145_v34  ;;  %v3140_v45 = vand.u32 4294901760, %v2235_v36  ;;  %v2262_v46 = vsub.f32 %v133_v13, %v2185_v16  ;;  %v2400_v34 = vld [vmem:[#allocation3 + $0x38] sm:$0xff]  ;;  %v2410_v30 = vld [vmem:[#allocation3 + $0x30] sm:$0xff] }
  0x3a   :  { %v267_v44 = vsub.f32 %v2212_v26, %v3143_v35  ;;  %157 = vmatprep.subr.mxu0 %v2185_v16  ;;  %v256_v48 = vand.u32 4294901760, %v255_v39  ;;  %v273_v49 = vsub.f32 %v2226_v32, %v3142_v40  ;;  %v3138_v50 = vand.u32 4294901760, %v2248_v41  ;;  %v2387_v40 = vld [vmem:[#allocation3 + $0x48] sm:$0xff]  ;;  %s2094_s9 = scalar_lea.vmem %s1683_s3, 512 }
  0x3b   :  { %3206 = vst [vmem:[#allocation19_spill] sm:$0xff] %v2251_v42  ;;  %v2272_v51 = vand.u32 4294901760, %v2240_v38  ;;  %159 = vmatpush1.msra.mxu0 %v2187_v17  ;;  %v262_v53 = vand.u32 4294901760, %v261_v43  ;;  %v279_v55 = vsub.f32 %v2235_v36, %v3140_v45  ;;  %v3137_v56 = vand.u32 4294901760, %v2262_v46  ;;  %p2095_p6 = scmp.ne.s32.totalorder %s1683_s3, %s2094_s9  ;;  %p2100_p8 = scmp.lt.s32.totalorder %s2094_s9, %s2094_s9 }
  0x3c   :  { %v268_v54 = vand.u32 4294901760, %v267_v44  ;;  %161 = vmatprep.subr.mxu0 %v2190_v18  ;;  %257 = vmatprep.subr.mxu1 %v256_v48  ;;  %v274_v59 = vand.u32 4294901760, %v273_v49  ;;  %v285_v60 = vsub.f32 %v2248_v41, %v3138_v50  ;;  %v2290_v61 = vsub.f32 %v132_v14, %v2187_v17 }
  0x3d   :  { %3207 = vst [vmem:[#allocation20_spill] sm:$0xff] %v2272_v51  ;;  %v2293_v62 = vand.u32 4294901760, %v2264_v47  ;;  %163 = vmatpush1.msra.mxu0 %v2203_v23  ;;  %263 = vmatpush1.msra.mxu1 %v262_v53  ;;  %v280_v1 = vand.u32 4294901760, %v279_v55  ;;  %v291_v2 = vsub.f32 %v2262_v46, %v3137_v56  ;;  %v2304_v3 = vsub.f32 %v2182_v15, %v2190_v18  ;;  %v2320_v15 = vld [vmem:[#allocation3 + $0x78] sm:$0xff]  ;;  %v2366_v56 = vld [vmem:[#allocation3 + $0x60] sm:$0xff]  ;;  %p2101_p9 = por %p2100_p8, %p2099_p7 }
  0x3e   :  { %v2307_v7 = vand.u32 4294901760, %v2274_v52  ;;  %165 = vmatprep.subr.mxu0 %v2209_v25  ;;  %269 = vmatprep.subr.mxu1 %v268_v54  ;;  %v286_v9 = vand.u32 4294901760, %v285_v60  ;;  %v3135_v13 = vand.u32 4294901760, %v2290_v61  ;;  %v2315_v14 = vsub.f32 %v2195_v20, %v2203_v23 }
  0x3f   :  { %3208 = vst [vmem:[#allocation21_spill] sm:$0xff] %v2293_v62  ;;  %v2318_v39 = vand.u32 4294901760, %v2281_v57  ;;  %167 = vmatpush1.msra.mxu0 %v2223_v31  ;;  %275 = vmatpush1.msra.mxu1 %v274_v59  ;;  %v292_v43 = vand.u32 4294901760, %v291_v2  ;;  %v3136_v44 = vand.u32 4294901760, %v2304_v3  ;;  %v2326_v48 = vsub.f32 %v2197_v21, %v2209_v25  ;;  %v2343_v21 = vld [vmem:[#allocation3 + $0x68] sm:$0xff]  ;;  %p2102_p10 = pnand %p2101_p9, %p2095_p6 }
  0x40   :  { %3209 = vst [vmem:[#allocation22_spill] sm:$0xff] %v2307_v7  ;;  %v2329_v49 = vand.u32 4294901760, %v2295_v63  ;;  %169 = vmatprep.subr.mxu0 %v2229_v33  ;;  %281 = vmatprep.subr.mxu1 %v280_v1  ;;  %v297_v20 = vsub.f32 %v2290_v61, %v3135_v13  ;;  %v3139_v53 = vand.u32 4294901760, %v2315_v14  ;;  %v2338_v54 = vsub.f32 %v2199_v22, %v2223_v31 }
  0x41   :  { %3210 = vst [vmem:[#allocation23_spill] sm:$0xff] %v2318_v39  ;;  %v2341_v55 = vand.u32 4294901760, %v2309_v8  ;;  %171 = vmatpush1.msra.mxu0 %v2238_v37  ;;  %287 = vmatpush1.msra.mxu1 %v286_v9  ;;  %v303_v59 = vsub.f32 %v2304_v3, %v3136_v44  ;;  %v3141_v60 = vand.u32 4294901760, %v2326_v48  ;;  %v2352_v1 = vsub.f32 %v2214_v27, %v2229_v33 }
  0x42   :  { %3211 = vst [vmem:[#allocation24_spill] sm:$0xff] %v2329_v49  ;;  %v2355_v22 = vand.u32 4294901760, %v2320_v15  ;;  %173 = vmatprep.subr.mxu0 %v2251_v42  ;;  %293 = vmatprep.subr.mxu1 %v292_v43  ;;  %v298_v2 = vand.u32 4294901760, %v297_v20  ;;  %v309_v9 = vsub.f32 %v2315_v14, %v3139_v53  ;;  %v3144_v13 = vand.u32 4294901760, %v2338_v54  ;;  %v2376_v53 = vld [vmem:[#allocation3 + $0x50] sm:$0xff] }
  0x43   :  { %3212 = vst [vmem:[#allocation25_spill] sm:$0xff] %v2341_v55  ;;  %v2364_v44 = vsub.f32 %v2216_v28, %v2238_v37  ;;  %175 = vmatpush1.msra.mxu0 %v2272_v51  ;;  %v304_v27 = vand.u32 4294901760, %v303_v59  ;;  %v315_v43 = vsub.f32 %v2326_v48, %v3141_v60  ;;  %v3146_v20 = vand.u32 4294901760, %v2352_v1 }
  0x44   :  { %3213 = vst [vmem:[#allocation26_spill] sm:$0xff] %v2355_v22  ;;  %v2374_v50 = vand.u32 4294901760, %v2343_v21  ;;  %299 = vmatpush1.msra.mxu1 %v298_v2  ;;  %177 = vmatprep.subr.mxu0 %v2293_v62  ;;  %v310_v28 = vand.u32 4294901760, %v309_v9  ;;  %v321_v45 = vsub.f32 %v2338_v54, %v3144_v13  ;;  %v2385_v60 = vsub.f32 %v2218_v29, %v2251_v42 }
  0x45   :  { %v3150_v59 = vand.u32 4294901760, %v2364_v44  ;;  %305 = vmatprep.subr.mxu1 %v304_v27  ;;  %179 = vmatpush1.msra.mxu0 %v2307_v7  ;;  %v316_v35 = vand.u32 4294901760, %v315_v43  ;;  %v327_v2 = vsub.f32 %v2352_v1, %v3146_v20  ;;  %v2394_v9 = vand.u32 4294901760, %v2366_v56 }
  0x46   :  { %3214 = vst [vmem:[#allocation27_spill] sm:$0xff] %v2374_v50  ;;  %v2398_v13 = vsub.f32 %v2240_v38, %v2272_v51  ;;  %311 = vmatpush1.msra.mxu1 %v310_v28  ;;  %181 = vmatprep.subr.mxu0 %v2318_v39  ;;  %v322_v29 = vand.u32 4294901760, %v321_v45  ;;  %v2408_v20 = vand.u32 4294901760, %v2376_v53  ;;  %v2416_v45 = vsub.f32 %v2264_v47, %v2293_v62 }
  0x47   :  { %3215 = vst [vmem:[#allocation28_spill] sm:$0xff] %v2394_v9  ;;  %v333_v27 = vsub.f32 %v2364_v44, %v3150_v59  ;;  %317 = vmatprep.subr.mxu1 %v316_v35  ;;  %183 = vmatpush1.msra.mxu0 %v2329_v49  ;;  %v328_v38 = vand.u32 4294901760, %v327_v2  ;;  %v2419_v0 = vand.u32 4294901760, %v2387_v40  ;;  %v2421_v59 = vld [vmem:[#allocation3 + $0x20] sm:$0xff]  ;;  %v3218_v35 = vand.u32 4294901760, %v2385_v60 }
  0x48   :  { %3216 = vst [vmem:[#allocation29_spill] sm:$0xff] %v2408_v20  ;;  %v3157_v28 = vand.u32 4294901760, %v2398_v13  ;;  %323 = vmatpush1.msra.mxu1 %v322_v29  ;;  %185 = vmatprep.subr.mxu0 %v2341_v55  ;;  %v2429_v2 = vsub.f32 %v2274_v52, %v2307_v7  ;;  %v2432_v47 = vand.u32 4294901760, %v2400_v34  ;;  %v2441_v62 = vsub.f32 %v2281_v57, %v2318_v39  ;;  %v2446_v52 = vld [vmem:[#allocation3 + $0x18] sm:$0xff]  ;;  %v2457_v57 = vld [vmem:[#allocation3 + $0x8] sm:$0xff] }
  0x49   :  { %3217 = vst [vmem:[#allocation30_spill] sm:$0xff] %v2419_v0  ;;  %v334_v43 = vand.u32 4294901760, %v333_v27  ;;  %v339_v51 = vsub.f32 %v2385_v60, %v3218_v35  ;;  %329 = vmatprep.subr.mxu1 %v328_v38  ;;  %187 = vmatpush1.msra.mxu0 %v2355_v22  ;;  %v2444_v35 = vand.u32 4294901760, %v2410_v30  ;;  %v2455_v27 = vand.u32 4294901760, %v2421_v59 }
  0x4a   :  { %3219 = vst [vmem:[#allocation31_spill] sm:$0xff] %v2432_v47  ;;  %v345_v29 = vsub.f32 %v2398_v13, %v3157_v28  ;;  %189 = vmatprep.subr.mxu0 %v2374_v50  ;;  %v2452_v28 = vsub.f32 %v2295_v63, %v2329_v49  ;;  %v3222_v42 = vand.u32 4294901760, %v2416_v45  ;;  %v2466_v7 = vsub.f32 %v2309_v8, %v2341_v55 }
  0x4b   :  { %3220 = vst [vmem:[#allocation32_spill] sm:$0xff] %v2444_v35  ;;  %335 = vmatpush1.msra.mxu1 %v334_v43  ;;  %v340_v38 = vand.u32 4294901760, %v339_v51  ;;  %3221 = vst [vmem:[#allocation33_spill] sm:$0xff] %v2455_v27  ;;  %191 = vmatpush1.msra.mxu0 %v2394_v9  ;;  %v3223_v63 = vand.u32 4294901760, %v2429_v2  ;;  %v2480_v51 = vld [vmem:[#allocation3] sm:$0xff]  ;;  %v2488_v37 = vand.u32 4294901760, %v2457_v57 }
  0x4c   :  { %v346_v39 = vand.u32 4294901760, %v345_v29  ;;  %v351_v43 = vsub.f32 %v2416_v45, %v3222_v42  ;;  %193 = vmatprep.subr.mxu0 %v2408_v20  ;;  %v2474_v29 = vand.u32 4294901760, %v2446_v52  ;;  %v2478_v42 = vsub.f32 %v2320_v15, %v2355_v22 }
  0x4d   :  { %341 = vmatprep.subr.mxu1 %v340_v38  ;;  %v357_v49 = vsub.f32 %v2429_v2, %v3223_v63  ;;  %195 = vmatpush1.msra.mxu0 %v2419_v0  ;;  %v3224_v38 = vand.u32 4294901760, %v2441_v62  ;;  %v3174_v63 = vand.u32 4294901760, %v2466_v7  ;;  %v3225_v15 = vand.u32 4294901760, %v2452_v28 }
  0x4e   :  { %347 = vmatpush1.msra.mxu1 %v346_v39  ;;  %v352_v8 = vand.u32 4294901760, %v351_v43  ;;  %197 = vmatprep.subr.mxu0 %v2432_v47  ;;  %v2497_v43 = vsub.f32 %v2343_v21, %v2374_v50  ;;  %v2504_v31 = vand.u32 4294901760, %v2480_v51  ;;  %v3226_v21 = vand.u32 4294901760, %v2478_v42 }
  0x4f   :  { %v363_v55 = vsub.f32 %v2441_v62, %v3224_v38  ;;  %v358_v33 = vand.u32 4294901760, %v357_v49  ;;  %v369_v22 = vsub.f32 %v2452_v28, %v3225_v15  ;;  %199 = vmatpush1.msra.mxu0 %v2444_v35  ;;  %v375_v49 = vsub.f32 %v2466_v7, %v3174_v63 }
  0x50   :  { %353 = vmatprep.subr.mxu1 %v352_v8  ;;  %v2508_v15 = vsub.f32 %v2366_v56, %v2394_v9  ;;  %201 = vmatprep.subr.mxu0 %v2455_v27  ;;  %v3177_v8 = vand.u32 4294901760, %v2497_v43  ;;  %v2517_v63 = vsub.f32 %v2376_v53, %v2408_v20 }
  0x51   :  { %v364_v38 = vand.u32 4294901760, %v363_v55  ;;  %359 = vmatpush1.msra.mxu1 %v358_v33  ;;  %v370_v39 = vand.u32 4294901760, %v369_v22  ;;  %v381_v55 = vsub.f32 %v2478_v42, %v3226_v21  ;;  %v376_v50 = vand.u32 4294901760, %v375_v49  ;;  %203 = vmatpush1.msra.mxu0 %v2474_v29 }
  0x52   :  { %v3178_v56 = vand.u32 4294901760, %v2508_v15  ;;  %v2522_v33 = vand.u32 4294901760, %v2283_v58  ;;  %v2526_v22 = vsub.f32 %v2387_v40, %v2419_v0  ;;  %205 = vmatprep.subr.mxu0 %v2488_v37  ;;  %v387_v53 = vsub.f32 %v2497_v43, %v3177_v8 }
  0x53   :  { %365 = vmatprep.subr.mxu1 %v364_v38  ;;  %v382_v21 = vand.u32 4294901760, %v381_v55  ;;  %v3181_v38 = vand.u32 4294901760, %v2517_v63  ;;  %v2535_v49 = vsub.f32 %v2400_v34, %v2432_v47  ;;  %207 = vmatpush1.msra.mxu0 %v2504_v31  ;;  %v2548_v8 = vsub.f32 %v2410_v30, %v2444_v35 }
  0x54   :  { %3227 = vst [vmem:[#allocation34_spill] sm:$0xff] %v2522_v33  ;;  %371 = vmatpush1.msra.mxu1 %v370_v39  ;;  %v393_v40 = vsub.f32 %v2508_v15, %v3178_v56  ;;  %v2543_v39 = vsub.f32 %v2283_v58, %v2522_v33  ;;  %v388_v34 = vand.u32 4294901760, %v387_v53  ;;  %486 = vmatprep.subr.mxu0 %v2193_v19  ;;  %v3229_v30 = vand.u32 4294901760, %v2526_v22 }
  0x55   :  { %377 = vmatprep.subr.mxu1 %v376_v50  ;;  %v399_v50 = vsub.f32 %v2517_v63, %v3181_v38  ;;  %v3188_v56 = vand.u32 4294901760, %v2535_v49  ;;  %v2557_v58 = vsub.f32 %v2421_v59, %v2455_v27  ;;  %v3189_v53 = vand.u32 4294901760, %v2548_v8 }
  0x56   :  { %383 = vmatpush1.msra.mxu1 %v382_v21  ;;  %v394_v47 = vand.u32 4294901760, %v393_v40  ;;  %v2560_v55 = vand.u32 4294901760, %v2543_v39  ;;  %v405_v21 = vsub.f32 %v2526_v22, %v3229_v30  ;;  %v2572_v59 = vsub.f32 %v2446_v52, %v2474_v29 }
  0x57   :  { %389 = vmatprep.subr.mxu1 %v388_v34  ;;  %v400_v38 = vand.u32 4294901760, %v399_v50  ;;  %v411_v35 = vsub.f32 %v2535_v49, %v3188_v56  ;;  %v3195_v0 = vand.u32 4294901760, %v2557_v58  ;;  %v417_v34 = vsub.f32 %v2548_v8, %v3189_v53 }
  0x58   :  { %3228 = vst [vmem:[#allocation35_spill] sm:$0xff] %v2560_v55  ;;  %3230 = vst [vmem:[#allocation36_spill] sm:$0xff] %v2572_v59  ;;  %395 = vmatpush1.msra.mxu1 %v394_v47  ;;  %v244_v40 = vsub.f32 %v2543_v39, %v2560_v55  ;;  %v406_v27 = vand.u32 4294901760, %v405_v21  ;;  %v2581_v50 = vsub.f32 %v2457_v57, %v2488_v37  ;;  %v3194_v47 = vand.u32 4294901760, %v2572_v59 }
  0x59   :  { %401 = vmatprep.subr.mxu1 %v400_v38  ;;  %v412_v30 = vand.u32 4294901760, %v411_v35  ;;  %v423_v52 = vsub.f32 %v2557_v58, %v3195_v0  ;;  %v2589_v56 = vsub.f32 %v2480_v51, %v2504_v31  ;;  %v418_v53 = vand.u32 4294901760, %v417_v34  ;;  %v3245_v0 = vld [vmem:[#allocation27_spill] sm:$0xff] }
  0x5a   :  { %v2591_v21 = vand.u32 4294901760, %v244_v40  ;;  %407 = vmatpush1.msra.mxu1 %v406_v27  ;;  %v3193_v55 = vand.u32 4294901760, %v2581_v50  ;;  %v429_v35 = vsub.f32 %v2572_v59, %v3194_v47  ;;  %v3244_v47 = vld [vmem:[#allocation26_spill] sm:$0xff] }
  0x5b   :  { %3231 = vst [vmem:[#allocation37_spill] sm:$0xff] %v2589_v56  ;;  %413 = vmatprep.subr.mxu1 %v412_v30  ;;  %v424_v57 = vand.u32 4294901760, %v423_v52  ;;  %v3192_v38 = vand.u32 4294901760, %v2589_v56  ;;  %v3233_v30 = vmov 0.0   ;;  %v3234_v52 = vld [vmem:[#allocation16_spill] sm:$0xff] }
  0x5c   :  { %3232 = vst [vmem:[#allocation38_spill] sm:$0xff] %v2591_v21  ;;  %246 = vmatmul.mubr.f32.vlgmr.msra.gmra.mxu0 %v2591_v21  ;;  %419 = vmatpush1.msra.mxu1 %v418_v53  ;;  %v435_v51 = vsub.f32 %v2581_v50, %v3193_v55  ;;  %v430_v27 = vand.u32 4294901760, %v429_v35  ;;  %v3236_v35 = vld [vmem:[#allocation18_spill] sm:$0xff]  ;;  %v3243_v55 = vld [vmem:[#allocation25_spill] sm:$0xff]  ;;  %v3246_v21 = vand.u32 4294901760, %v2193_v19  ;;  %v3254_v19 = vand.u32 4294901760, %v2235_v36 }
  0x5d   :  { %489 = vmatpush1.msra.mxu0 %v2206_v24  ;;  %425 = vmatprep.subr.mxu1 %v424_v57  ;;  %v441_v40 = vsub.f32 %v2589_v56, %v3192_v38  ;;  %v3235_v57 = vld [vmem:[#allocation17_spill] sm:$0xff]  ;;  %v3242_v38 = vld [vmem:[#allocation24_spill] sm:$0xff] }
  0x5e   :  { %492 = vmatprep.subr.mxu0 %v2212_v26  ;;  %v436_v34 = vand.u32 4294901760, %v435_v51  ;;  %612 = vmatprep.mubr.f32.mxu0 %v3233_v30  ;;  %v3237_v51 = vld [vmem:[#allocation19_spill] sm:$0xff] }
  0x5f   :  { %495 = vmatpush1.msra.mxu0 %v2226_v32  ;;  %431 = vmatpush1.msra.mxu1 %v430_v27  ;;  %v442_v53 = vand.u32 4294901760, %v441_v40  ;;  %v3238_v27 = vld [vmem:[#allocation20_spill] sm:$0xff]  ;;  %v3239_v40 = vld [vmem:[#allocation21_spill] sm:$0xff] }
  0x60   :  { %498 = vmatprep.subr.mxu0 %v2235_v36  ;;  %437 = vmatprep.subr.mxu1 %v436_v34  ;;  %v3240_v34 = vld [vmem:[#allocation22_spill] sm:$0xff]  ;;  %v3259_v36 = vand.u32 4294901760, %v2304_v3 }
  0x61   :  { %501 = vmatpush1.msra.mxu0 %v2248_v41  ;;  %443 = vmatpush1.msra.mxu1 %v442_v53  ;;  %v3241_v53 = vld [vmem:[#allocation23_spill] sm:$0xff] }
  0x62   :  { %504 = vmatprep.subr.mxu0 %v2262_v46  ;;  %478 = vmatmul.mubr.f32.vlgmr.msra.gmra.mxu1 %v2522_v33  ;;  %v3247_v33 = vld [vmem:[#allocation30_spill] sm:$0xff] }
  0x63   :  { %507 = vmatpush1.msra.mxu0 %v2290_v61  ;;  %622 = vmatprep.subr.mxu1 %v2170_v4 }
  0x64   :  { %510 = vmatprep.subr.mxu0 %v2304_v3  ;;  %624 = vmatpush1.msra.mxu1 %v2172_v5  ;;  %v3263_v3 = vand.u32 4294901760, %v2352_v1 }
  0x65   :  { %513 = vmatpush1.msra.mxu0 %v2315_v14  ;;  %626 = vmatprep.subr.mxu1 %v2174_v6 }
  0x66   :  { %516 = vmatprep.subr.mxu0 %v2326_v48  ;;  %628 = vmatpush1.msra.mxu1 %v2176_v10 }
  0x67   :  { %519 = vmatpush1.msra.mxu0 %v2338_v54  ;;  %630 = vmatprep.subr.mxu1 %v2178_v11 }
  0x68   :  { %522 = vmatprep.subr.mxu0 %v2352_v1  ;;  %632 = vmatpush1.msra.mxu1 %v2180_v12  ;;  %v3277_v1 = vand.u32 4294901760, %v2535_v49 }
  0x69   :  { %525 = vmatpush1.msra.mxu0 %v2364_v44  ;;  %634 = vmatprep.subr.mxu1 %v2185_v16 }
  0x6a   :  { %528 = vmatprep.subr.mxu0 %v2385_v60  ;;  %636 = vmatpush1.msra.mxu1 %v2187_v17 }
  0x6b   :  { %531 = vmatpush1.msra.mxu0 %v2398_v13  ;;  %638 = vmatprep.subr.mxu1 %v2190_v18 }
  0x6c   :  { %534 = vmatprep.subr.mxu0 %v2416_v45  ;;  %640 = vmatpush1.msra.mxu1 %v2203_v23 }
  0x6d   :  { %537 = vmatpush1.msra.mxu0 %v2429_v2  ;;  %642 = vmatprep.subr.mxu1 %v2209_v25 }
  0x6e   :  { %540 = vmatprep.subr.mxu0 %v2441_v62  ;;  %644 = vmatpush1.msra.mxu1 %v3234_v52 }
  0x6f   :  { %543 = vmatpush1.msra.mxu0 %v2452_v28  ;;  %646 = vmatprep.subr.mxu1 %v3235_v57 }
  0x70   :  { %546 = vmatprep.subr.mxu0 %v2466_v7  ;;  %648 = vmatpush1.msra.mxu1 %v3236_v35 }
  0x71   :  { %549 = vmatpush1.msra.mxu0 %v2478_v42  ;;  %650 = vmatprep.subr.mxu1 %v3237_v51 }
  0x72   :  { %552 = vmatprep.subr.mxu0 %v2497_v43  ;;  %652 = vmatpush1.msra.mxu1 %v3238_v27 }
  0x73   :  { %555 = vmatpush1.msra.mxu0 %v2508_v15  ;;  %654 = vmatprep.subr.mxu1 %v3239_v40 }
  0x74   :  { %558 = vmatprep.subr.mxu0 %v2517_v63  ;;  %656 = vmatpush1.msra.mxu1 %v3240_v34 }
  0x75   :  { %561 = vmatpush1.msra.mxu0 %v2526_v22  ;;  %658 = vmatprep.subr.mxu1 %v3241_v53 }
  0x76   :  { %564 = vmatprep.subr.mxu0 %v2535_v49  ;;  %660 = vmatpush1.msra.mxu1 %v3242_v38  ;;  %v3283_v49 = vand.u32 4294901760, %v2581_v50 }
  0x77   :  { %567 = vmatpush1.msra.mxu0 %v2548_v8  ;;  %662 = vmatprep.subr.mxu1 %v3243_v55 }
  0x78   :  { %570 = vmatprep.subr.mxu0 %v2557_v58  ;;  %664 = vmatpush1.msra.mxu1 %v3244_v47  ;;  %v3248_v47 = vand.u32 4294901760, %v2206_v24  ;;  %v3255_v24 = vand.u32 4294901760, %v2248_v41  ;;  %v3260_v41 = vand.u32 4294901760, %v2315_v14  ;;  %v3275_v14 = vand.u32 4294901760, %v2517_v63 }
  0x79   :  { %573 = vmatpush1.msra.mxu0 %v2572_v59  ;;  %666 = vmatprep.subr.mxu1 %v3245_v0  ;;  %v3249_v59 = vld [vmem:[#allocation31_spill] sm:$0xff]  ;;  %v3250_v0 = vand.u32 4294901760, %v2212_v26  ;;  %v3256_v26 = vand.u32 4294901760, %v2262_v46  ;;  %v3261_v46 = vand.u32 4294901760, %v2326_v48  ;;  %v3276_v48 = vand.u32 4294901760, %v2526_v22 }
  0x7a   :  { %576 = vmatprep.subr.mxu0 %v2581_v50  ;;  %668 = vmatpush1.msra.mxu1 %v2394_v9  ;;  %v3251_v9 = vld [vmem:[#allocation32_spill] sm:$0xff] }
  0x7b   :  { %579 = vmatpush1.msra.mxu0 %v2589_v56  ;;  %670 = vmatprep.subr.mxu1 %v2408_v20  ;;  %v3252_v56 = vand.u32 4294901760, %v2226_v32  ;;  %v3253_v20 = vld [vmem:[#allocation33_spill] sm:$0xff]  ;;  %v3258_v32 = vld [vmem:[#allocation35_spill] sm:$0xff] }
  0x7c   :  { %615 = vmatmul.mubr.f32.vlgmr.msra.gmra.mxu0 %v2543_v39  ;;  %730 = vmatprep.subr.mxu0 %v3246_v21  ;;  %v3285_v21 = vld [vmem:[#allocation37_spill] sm:$0xff] }
  0x7d   :  { %672 = vmatpush1.msra.mxu1 %v3247_v33  ;;  %734 = vmatpush1.msra.mxu0 %v3248_v47  ;;  %v3284_v47 = vld [vmem:[#allocation27_spill] sm:$0xff] }
  0x7e   :  { %674 = vmatprep.subr.mxu1 %v3249_v59  ;;  %738 = vmatprep.subr.mxu0 %v3250_v0  ;;  %v3257_v0 = vand.u32 4294901760, %v2290_v61  ;;  %v3262_v61 = vand.u32 4294901760, %v2338_v54 }
  0x7f   :  { %676 = vmatpush1.msra.mxu1 %v3251_v9  ;;  %742 = vmatpush1.msra.mxu0 %v3252_v56 }
  0x80   :  { %678 = vmatprep.subr.mxu1 %v3253_v20  ;;  %746 = vmatprep.subr.mxu0 %v3254_v19  ;;  %v122_v19 = vld [vmem:[#allocation3 + $0xd0] sm:$0xff] }
  0x81   :  { %680 = vmatpush1.msra.mxu1 %v2474_v29  ;;  %750 = vmatpush1.msra.mxu0 %v3255_v24 }
  0x82   :  { %682 = vmatprep.subr.mxu1 %v2488_v37  ;;  %754 = vmatprep.subr.mxu0 %v3256_v26 }
  0x83   :  { %684 = vmatpush1.msra.mxu1 %v2504_v31  ;;  %717 = vmatprep.mubr.f32.mxu1 %v3233_v30 }
  0x84   :  { %758 = vmatpush1.msra.mxu0 %v3257_v0  ;;  %721 = vmatmul.mubr.f32.vlgmr.msra.gmra.mxu1 %v3258_v32 }
  0x85   :  { %762 = vmatprep.subr.mxu0 %v3259_v36  ;;  %896 = vmatprep.subr.mxu1 %v2170_v4  ;;  %v3264_v4 = vand.u32 4294901760, %v2364_v44  ;;  %v137_v44 = vld [vmem:[#allocation3 + $0x148] sm:$0xff] }
  0x86   :  { %766 = vmatpush1.msra.mxu0 %v3260_v41  ;;  %898 = vmatpush1.msra.mxu1 %v2172_v5  ;;  %v3265_v5 = vand.u32 4294901760, %v2385_v60  ;;  %v134_v60 = vld [vmem:[#allocation3 + $0x130] sm:$0xff]  ;;  %v119_v41 = vld [vmem:[#allocation3 + $0xb8] sm:$0xff] }
  0x87   :  { %770 = vmatprep.subr.mxu0 %v3261_v46  ;;  %900 = vmatprep.subr.mxu1 %v2174_v6  ;;  %v3266_v6 = vand.u32 4294901760, %v2398_v13  ;;  %v3272_v13 = vand.u32 4294901760, %v2478_v42  ;;  %v3279_v42 = vand.u32 4294901760, %v2557_v58  ;;  %v2761_v63 = vand.u32 4294901760, %v134_v60  ;;  %v128_v58 = vld [vmem:[#allocation3 + $0x100] sm:$0xff] }
  0x88   :  { %774 = vmatpush1.msra.mxu0 %v3262_v61  ;;  %902 = vmatpush1.msra.mxu1 %v2176_v10  ;;  %v3267_v10 = vand.u32 4294901760, %v2416_v45  ;;  %v2815_v61 = vand.u32 4294901760, %v122_v19 }
  0x89   :  { %778 = vmatprep.subr.mxu0 %v3263_v3  ;;  %904 = vmatprep.subr.mxu1 %v2178_v11  ;;  %v3268_v11 = vand.u32 4294901760, %v2429_v2  ;;  %v2756_v2 = vand.u32 4294901760, %v137_v44  ;;  %v2784_v50 = vsub.f32 %v134_v60, %v2761_v63  ;;  %v116_v3 = vld [vmem:[#allocation3 + $0xa0] sm:$0xff] }
  0x8a   :  { %782 = vmatpush1.msra.mxu0 %v3264_v4  ;;  %906 = vmatpush1.msra.mxu1 %v2180_v12  ;;  %v3269_v12 = vand.u32 4294901760, %v2441_v62  ;;  %v3274_v62 = vand.u32 4294901760, %v2508_v15  ;;  %v3280_v15 = vld [vmem:[#allocation36_spill] sm:$0xff] }
  0x8b   :  { %786 = vmatprep.subr.mxu0 %v3265_v5  ;;  %908 = vmatprep.subr.mxu1 %v2185_v16  ;;  %v3270_v16 = vand.u32 4294901760, %v2452_v28  ;;  %v3278_v28 = vand.u32 4294901760, %v2548_v8  ;;  %v3281_v56 = vand.u32 4294901760, %v3280_v15  ;;  %v3282_v8 = vld [vmem:[#allocation26_spill] sm:$0xff] }
  0x8c   :  { %790 = vmatpush1.msra.mxu0 %v3266_v6  ;;  %910 = vmatpush1.msra.mxu1 %v2187_v17  ;;  %v3271_v17 = vand.u32 4294901760, %v2466_v7 }
  0x8d   :  { %794 = vmatprep.subr.mxu0 %v3267_v10  ;;  %912 = vmatprep.subr.mxu1 %v2190_v18  ;;  %v143_v18 = vld [vmem:[#allocation3 + $0x178] sm:$0xff] }
  0x8e   :  { %798 = vmatpush1.msra.mxu0 %v3268_v11  ;;  %914 = vmatpush1.msra.mxu1 %v2203_v23  ;;  %v3273_v23 = vand.u32 4294901760, %v2497_v43  ;;  %v2737_v7 = vand.u32 4294901760, %v143_v18  ;;  %v131_v43 = vld [vmem:[#allocation3 + $0x118] sm:$0xff]  ;;  %v2838_v11 = vsub.f32 %v122_v19, %v2815_v61 }
  0x8f   :  { %802 = vmatprep.subr.mxu0 %v3269_v12  ;;  %916 = vmatprep.subr.mxu1 %v2209_v25  ;;  %v140_v25 = vld [vmem:[#allocation3 + $0x160] sm:$0xff]  ;;  %v2840_v12 = vand.u32 4294901760, %v116_v3 }
  0x90   :  { %806 = vmatpush1.msra.mxu0 %v3270_v16  ;;  %918 = vmatpush1.msra.mxu1 %v3234_v52  ;;  %v2745_v54 = vand.u32 4294901760, %v140_v25  ;;  %v2754_v45 = vsub.f32 %v143_v18, %v2737_v7  ;;  %v2778_v52 = vand.u32 4294901760, %v131_v43  ;;  %v1142_v60 = vand.u32 4294901760, %v2838_v11 }
  0x91   :  { %810 = vmatprep.subr.mxu0 %v3271_v17  ;;  %920 = vmatprep.subr.mxu1 %v3235_v57  ;;  %v110_v17 = vld [vmem:[#allocation3 + $0x70] sm:$0xff] }
  0x92   :  { %814 = vmatpush1.msra.mxu0 %v3272_v13  ;;  %922 = vmatpush1.msra.mxu1 %v3236_v35  ;;  %v2767_v22 = vsub.f32 %v140_v25, %v2745_v54  ;;  %v1093_v57 = vand.u32 4294901760, %v2754_v45  ;;  %v3287_v35 = vld [vmem:[#allocation28_spill] sm:$0xff]  ;;  %v2796_v24 = vsub.f32 %v131_v43, %v2778_v52 }
  0x93   :  { %818 = vmatprep.subr.mxu0 %v3273_v23  ;;  %924 = vmatprep.subr.mxu1 %v3237_v51  ;;  %v3288_v51 = vld [vmem:[#allocation34_spill] sm:$0xff] }
  0x94   :  { %822 = vmatpush1.msra.mxu0 %v3274_v62  ;;  %926 = vmatpush1.msra.mxu1 %v3238_v27  ;;  %v125_v27 = vld [vmem:[#allocation3 + $0xe8] sm:$0xff]  ;;  %v1094_v26 = vsub.f32 %v2754_v45, %v1093_v57  ;;  %v1121_v6 = vand.u32 4294901760, %v2796_v24 }
  0x95   :  { %826 = vmatprep.subr.mxu0 %v3275_v14  ;;  %928 = vmatprep.subr.mxu1 %v3239_v40  ;;  %v3289_v40 = vld [vmem:[#allocation29_spill] sm:$0xff]  ;;  %v2801_v0 = vand.u32 4294901760, %v125_v27  ;;  %v2859_v14 = vsub.f32 %v116_v3, %v2840_v12 }
  0x96   :  { %830 = vmatpush1.msra.mxu0 %v3276_v48  ;;  %930 = vmatpush1.msra.mxu1 %v3240_v34  ;;  %v2788_v34 = vand.u32 4294901760, %v128_v58  ;;  %v1122_v13 = vsub.f32 %v2796_v24, %v1121_v6  ;;  %v2864_v48 = vand.u32 4294901760, %v110_v17 }
  0x97   :  { %834 = vmatprep.subr.mxu0 %v3277_v1  ;;  %932 = vmatprep.subr.mxu1 %v3241_v53  ;;  %v1100_v53 = vand.u32 4294901760, %v2767_v22  ;;  %v2824_v4 = vsub.f32 %v125_v27, %v2801_v0  ;;  %v107_v1 = vld [vmem:[#allocation3 + $0x58] sm:$0xff] }
  0x98   :  { %838 = vmatpush1.msra.mxu0 %v3278_v28  ;;  %934 = vmatpush1.msra.mxu1 %v3242_v38  ;;  %v3286_v38 = vand.u32 4294901760, %v3285_v21  ;;  %v1123_v28 = vand.u32 4294901760, %v1122_v13  ;;  %v1156_v21 = vand.u32 4294901760, %v2859_v14 }
  0x99   :  { %842 = vmatprep.subr.mxu0 %v3279_v42  ;;  %936 = vmatprep.subr.mxu1 %v3243_v55  ;;  %v2776_v55 = vsub.f32 %v137_v44, %v2756_v2  ;;  %v1101_v46 = vsub.f32 %v2767_v22, %v1100_v53  ;;  %v1135_v25 = vand.u32 4294901760, %v2824_v4 }
  0x9a   :  { %846 = vmatpush1.msra.mxu0 %v3281_v56  ;;  %938 = vmatpush1.msra.mxu1 %v3282_v8  ;;  %v104_v56 = vld [vmem:[#allocation3 + $0x40] sm:$0xff]  ;;  %v2879_v8 = vand.u32 4294901760, %v107_v1 }
  0x9b   :  { %850 = vmatprep.subr.mxu0 %v3283_v49  ;;  %940 = vmatprep.subr.mxu1 %v3284_v47  ;;  %v1107_v36 = vand.u32 4294901760, %v2776_v55  ;;  %v1102_v10 = vand.u32 4294901760, %v1101_v46  ;;  %v1136_v43 = vsub.f32 %v2824_v4, %v1135_v25  ;;  %v2883_v47 = vsub.f32 %v110_v17, %v2864_v48 }
  0x9c   :  { %854 = vmatpush1.msra.mxu0 %v3286_v38  ;;  %887 = vmatprep.mubr.f32.mxu0 %v3233_v30  ;;  %v101_v38 = vld [vmem:[#allocation3 + $0x28] sm:$0xff] }
  0x9d   :  { %942 = vmatpush1.msra.mxu1 %v3287_v35  ;;  %889 = vmatmul.mubr.f32.vlgmr.msra.gmra.mxu0 %v3288_v51  ;;  %v1108_v5 = vsub.f32 %v2776_v55, %v1107_v36  ;;  %v2891_v35 = vand.u32 4294901760, %v104_v56  ;;  %v1137_v27 = vand.u32 4294901760, %v1136_v43  ;;  %v2903_v46 = vand.u32 4294901760, %v101_v38 }
  0x9e   :  { %944 = vmatprep.subr.mxu1 %v3289_v40  ;;  %1795 = vmatprep.subr.mxu0 %v3233_v30 }
  0x9f   :  { %946 = vmatpush1.msra.mxu1 %v3247_v33  ;;  %1796 = vmatpush3.msra.mxu0 %v2737_v7  ;;  %v1114_v33 = vand.u32 4294901760, %v2784_v50  ;;  %v1109_v18 = vand.u32 4294901760, %v1108_v5  ;;  %v1170_v5 = vand.u32 4294901760, %v2883_v47 }
  0xa0   :  { %948 = vmatprep.subr.mxu1 %v3249_v59  ;;  %1797 = vmatprep.subr.mxu0 %v3233_v30  ;;  %v2810_v59 = vsub.f32 %v128_v58, %v2788_v34  ;;  %v1143_v58 = vsub.f32 %v2838_v11, %v1142_v60 }
  0xa1   :  { %950 = vmatpush1.msra.mxu1 %v3251_v9  ;;  %1798 = vmatpush3.msra.mxu0 %v2745_v54  ;;  %v2819_v9 = vand.u32 4294901760, %v119_v41 }
  0xa2   :  { %952 = vmatprep.subr.mxu1 %v3253_v20  ;;  %1799 = vmatprep.subr.mxu0 %v3233_v30  ;;  %v1095_v20 = vand.u32 4294901760, %v1094_v26  ;;  %v1128_v16 = vand.u32 4294901760, %v2810_v59  ;;  %v98_v26 = vld [vmem:[#allocation3 + $0x10] sm:$0xff]  ;;  %v1144_v3 = vand.u32 4294901760, %v1143_v58 }
  0xa3   :  { %954 = vmatpush1.msra.mxu1 %v2474_v29  ;;  %1800 = vmatpush3.msra.mxu0 %v2756_v2  ;;  %v113_v29 = vld [vmem:[#allocation3 + $0x88] sm:$0xff] }
  0xa4   :  { %956 = vmatprep.subr.mxu1 %v2488_v37  ;;  %1801 = vmatprep.subr.mxu0 %v3233_v30  ;;  %v1115_v37 = vsub.f32 %v2784_v50, %v1114_v33  ;;  %v2852_v23 = vand.u32 4294901760, %v113_v29  ;;  %v1129_v44 = vsub.f32 %v2810_v59, %v1128_v16 }
  0xa5   :  { %958 = vmatpush1.msra.mxu1 %v2504_v31  ;;  %991 = vmatprep.mubr.f32.mxu1 %v3233_v30  ;;  %v2846_v31 = vsub.f32 %v119_v41, %v2819_v9  ;;  %v2901_v41 = vsub.f32 %v107_v1, %v2879_v8 }
  0xa6   :  { %1802 = vmatpush3.msra.mxu0 %v2761_v63  ;;  %993 = vmatmul.mubr.f32.vlgmr.msra.gmra.mxu1 %v3288_v51  ;;  %v1116_v62 = vand.u32 4294901760, %v1115_v37  ;;  %v2871_v42 = vsub.f32 %v113_v29, %v2852_v23  ;;  %v1130_v49 = vand.u32 4294901760, %v1129_v44  ;;  %v2913_v37 = vsub.f32 %v104_v56, %v2891_v35 }
  0xa7   :  { %1803 = vmatprep.subr.mxu0 %v3233_v30  ;;  %1830 = vmatprep.subr.mxu1 %v3233_v30  ;;  %v1149_v15 = vand.u32 4294901760, %v2846_v31  ;;  %v2915_v29 = vand.u32 4294901760, %v98_v26  ;;  %v1177_v13 = vand.u32 4294901760, %v2901_v41  ;;  %v1171_v44 = vsub.f32 %v2883_v47, %v1170_v5 }
  0xa8   :  { %1804 = vmatpush3.msra.mxu0 %v2778_v52  ;;  %1831 = vmatpush3.msra.mxu1 %v1095_v20  ;;  %v1163_v19 = vand.u32 4294901760, %v2871_v42  ;;  %v1157_v20 = vsub.f32 %v2859_v14, %v1156_v21 }
  0xa9   :  { %1805 = vmatprep.subr.mxu0 %v3233_v30  ;;  %1832 = vmatprep.subr.mxu1 %v3233_v30  ;;  %v1150_v40 = vsub.f32 %v2846_v31, %v1149_v15  ;;  %v2934_v1 = vsub.f32 %v98_v26, %v2915_v29  ;;  %v1178_v56 = vsub.f32 %v2901_v41, %v1177_v13  ;;  %v1172_v58 = vand.u32 4294901760, %v1171_v44 }
  0xaa   :  { %1806 = vmatpush3.msra.mxu0 %v2788_v34  ;;  %1833 = vmatpush3.msra.mxu1 %v1102_v10  ;;  %v1164_v17 = vsub.f32 %v2871_v42, %v1163_v19 }
  0xab   :  { %1807 = vmatprep.subr.mxu0 %v3233_v30  ;;  %1834 = vmatprep.subr.mxu1 %v3233_v30  ;;  %v1151_v10 = vand.u32 4294901760, %v1150_v40  ;;  %v1179_v40 = vand.u32 4294901760, %v1178_v56 }
  0xac   :  { %1808 = vmatpush3.msra.mxu0 %v2801_v0  ;;  %1835 = vmatpush3.msra.mxu1 %v1109_v18  ;;  %v2924_v18 = vsub.f32 %v101_v38, %v2903_v46  ;;  %v1165_v43 = vand.u32 4294901760, %v1164_v17 }
  0xad   :  { %1809 = vmatprep.subr.mxu0 %v3233_v30  ;;  %1836 = vmatprep.subr.mxu1 %v3233_v30 }
  0xae   :  { %1810 = vmatpush3.msra.mxu0 %v2815_v61  ;;  %1837 = vmatpush3.msra.mxu1 %v1116_v62  ;;  %v1158_v62 = vand.u32 4294901760, %v1157_v20 }
  0xaf   :  { %1811 = vmatprep.subr.mxu0 %v3233_v30  ;;  %1838 = vmatprep.subr.mxu1 %v3233_v30 }
  0xb0   :  { %1812 = vmatpush3.msra.mxu0 %v2819_v9  ;;  %1839 = vmatpush3.msra.mxu1 %v1123_v28  ;;  %v1184_v28 = vand.u32 4294901760, %v2913_v37 }
  0xb1   :  { %1813 = vmatprep.subr.mxu0 %v3233_v30  ;;  %1840 = vmatprep.subr.mxu1 %v3233_v30 }
  0xb2   :  { %1814 = vmatpush3.msra.mxu0 %v2840_v12  ;;  %1841 = vmatpush3.msra.mxu1 %v1130_v49  ;;  %v1191_v49 = vand.u32 4294901760, %v2924_v18  ;;  %v1185_v38 = vsub.f32 %v2913_v37, %v1184_v28 }
  0xb3   :  { %1815 = vmatprep.subr.mxu0 %v3233_v30  ;;  %1842 = vmatprep.subr.mxu1 %v3233_v30 }
  0xb4   :  { %1816 = vmatpush3.msra.mxu0 %v2852_v23  ;;  %1843 = vmatpush3.msra.mxu1 %v1137_v27  ;;  %v1198_v27 = vand.u32 4294901760, %v2934_v1  ;;  %v1192_v26 = vsub.f32 %v2924_v18, %v1191_v49 }
  0xb5   :  { %1817 = vmatprep.subr.mxu0 %v3233_v30  ;;  %1844 = vmatprep.subr.mxu1 %v3233_v30 }
  0xb6   :  { %1818 = vmatpush3.msra.mxu0 %v2864_v48  ;;  %1845 = vmatpush3.msra.mxu1 %v1144_v3  ;;  %v1186_v3 = vand.u32 4294901760, %v1185_v38  ;;  %v1199_v20 = vsub.f32 %v2934_v1, %v1198_v27  ;;  %v1193_v17 = vand.u32 4294901760, %v1192_v26 }
  0xb7   :  { %1819 = vmatprep.subr.mxu0 %v3233_v30  ;;  %1846 = vmatprep.subr.mxu1 %v3233_v30 }
  0xb8   :  { %1820 = vmatpush3.msra.mxu0 %v2879_v8  ;;  %1847 = vmatpush3.msra.mxu1 %v1151_v10  ;;  %v3290_v10 = vld [vmem:[#allocation38_spill] sm:$0xff] }
  0xb9   :  { %1821 = vmatprep.subr.mxu0 %v3233_v30  ;;  %1848 = vmatprep.subr.mxu1 %v3233_v30 }
  0xba   :  { %1822 = vmatpush3.msra.mxu0 %v2891_v35  ;;  %1849 = vmatpush3.msra.mxu1 %v1158_v62  ;;  %v1200_v62 = vand.u32 4294901760, %v1199_v20 }
  0xbb   :  { %1823 = vmatprep.subr.mxu0 %v3233_v30  ;;  %1850 = vmatprep.subr.mxu1 %v3233_v30 }
  0xbc   :  { %1824 = vmatpush3.msra.mxu0 %v2903_v46  ;;  %1851 = vmatpush3.msra.mxu1 %v1165_v43 }
  0xbd   :  { %1825 = vmatprep.subr.mxu0 %v3233_v30  ;;  %1852 = vmatprep.subr.mxu1 %v3233_v30 }
  0xbe   :  { %1826 = vmatpush3.msra.mxu0 %v2915_v29  ;;  %1853 = vmatpush3.msra.mxu1 %v1172_v58 }
  0xbf   :  { %1827 = vmatprep.mubr.msk.f32.mxu0 %vm2129_vm0, %v3233_v30  ;;  %1854 = vmatprep.subr.mxu1 %v3233_v30 }
  0xc0   :  { %1865 = vmatprep.subr.mxu0 %v3233_v30  ;;  %1828 = vmatmul.mubr.f32.vlgmr.msra.gmra.mxu0 %v3290_v10 }
  0xc1   :  { %1855 = vmatpush3.msra.mxu1 %v1179_v40  ;;  %1866 = vmatpush3.msra.mxu0 %v2754_v45 }
  0xc2   :  { %1856 = vmatprep.subr.mxu1 %v3233_v30  ;;  %1867 = vmatprep.subr.mxu0 %v3233_v30 }
  0xc3   :  { %1857 = vmatpush3.msra.mxu1 %v1186_v3  ;;  %1868 = vmatpush3.msra.mxu0 %v2767_v22 }
  0xc4   :  { %1858 = vmatprep.subr.mxu1 %v3233_v30  ;;  %1869 = vmatprep.subr.mxu0 %v3233_v30 }
  0xc5   :  { %1859 = vmatpush3.msra.mxu1 %v1193_v17  ;;  %1870 = vmatpush3.msra.mxu0 %v2776_v55 }
  0xc6   :  { %1860 = vmatprep.subr.mxu1 %v3233_v30  ;;  %1871 = vmatprep.subr.mxu0 %v3233_v30 }
  0xc7   :  { %1861 = vmatpush3.msra.mxu1 %v1200_v62  ;;  %1862 = vmatprep.mubr.msk.f32.mxu1 %vm2129_vm0, %v3233_v30 }
  0xc8   :  { %1872 = vmatpush3.msra.mxu0 %v2784_v50  ;;  %1863 = vmatmul.mubr.f32.vlgmr.msra.gmra.mxu1 %v3288_v51 }
  0xc9   :  { %1873 = vmatprep.subr.mxu0 %v3233_v30  ;;  %1900 = vmatprep.subr.mxu1 %v3233_v30 }
  0xca   :  { %1874 = vmatpush3.msra.mxu0 %v2796_v24  ;;  %1901 = vmatpush3.msra.mxu1 %v2737_v7 }
  0xcb   :  { %1875 = vmatprep.subr.mxu0 %v3233_v30  ;;  %1902 = vmatprep.subr.mxu1 %v3233_v30 }
  0xcc   :  { %1876 = vmatpush3.msra.mxu0 %v2810_v59  ;;  %1903 = vmatpush3.msra.mxu1 %v2745_v54 }
  0xcd   :  { %1877 = vmatprep.subr.mxu0 %v3233_v30  ;;  %1904 = vmatprep.subr.mxu1 %v3233_v30 }
  0xce   :  { %1878 = vmatpush3.msra.mxu0 %v2824_v4  ;;  %1905 = vmatpush3.msra.mxu1 %v2756_v2 }
  0xcf   :  { %1879 = vmatprep.subr.mxu0 %v3233_v30  ;;  %1906 = vmatprep.subr.mxu1 %v3233_v30 }
  0xd0   :  { %1880 = vmatpush3.msra.mxu0 %v2838_v11  ;;  %1907 = vmatpush3.msra.mxu1 %v2761_v63 }
  0xd1   :  { %1881 = vmatprep.subr.mxu0 %v3233_v30  ;;  %1908 = vmatprep.subr.mxu1 %v3233_v30 }
  0xd2   :  { %1882 = vmatpush3.msra.mxu0 %v2846_v31  ;;  %1909 = vmatpush3.msra.mxu1 %v2778_v52 }
  0xd3   :  { %1883 = vmatprep.subr.mxu0 %v3233_v30  ;;  %1910 = vmatprep.subr.mxu1 %v3233_v30 }
  0xd4   :  { %1884 = vmatpush3.msra.mxu0 %v2859_v14  ;;  %1911 = vmatpush3.msra.mxu1 %v2788_v34 }
  0xd5   :  { %1885 = vmatprep.subr.mxu0 %v3233_v30  ;;  %1912 = vmatprep.subr.mxu1 %v3233_v30 }
  0xd6   :  { %1886 = vmatpush3.msra.mxu0 %v2871_v42  ;;  %1913 = vmatpush3.msra.mxu1 %v2801_v0 }
  0xd7   :  { %1887 = vmatprep.subr.mxu0 %v3233_v30  ;;  %1914 = vmatprep.subr.mxu1 %v3233_v30 }
  0xd8   :  { %1888 = vmatpush3.msra.mxu0 %v2883_v47  ;;  %1915 = vmatpush3.msra.mxu1 %v2815_v61 }
  0xd9   :  { %1889 = vmatprep.subr.mxu0 %v3233_v30  ;;  %1916 = vmatprep.subr.mxu1 %v3233_v30 }
  0xda   :  { %1890 = vmatpush3.msra.mxu0 %v2901_v41  ;;  %1917 = vmatpush3.msra.mxu1 %v2819_v9 }
  0xdb   :  { %1891 = vmatprep.subr.mxu0 %v3233_v30  ;;  %1918 = vmatprep.subr.mxu1 %v3233_v30 }
  0xdc   :  { %1892 = vmatpush3.msra.mxu0 %v2913_v37  ;;  %1919 = vmatpush3.msra.mxu1 %v2840_v12  ;;  %v92_v37 = vld [vmem:[#allocation8 + $0x10] sm:$0xff] }
  0xdd   :  { %1893 = vmatprep.subr.mxu0 %v3233_v30  ;;  %1920 = vmatprep.subr.mxu1 %v3233_v30 }
  0xde   :  { %1894 = vmatpush3.msra.mxu0 %v2924_v18  ;;  %1921 = vmatpush3.msra.mxu1 %v2852_v23 }
  0xdf   :  { %1895 = vmatprep.subr.mxu0 %v3233_v30  ;;  %1922 = vmatprep.subr.mxu1 %v3233_v30 }
  0xe0   :  { %1896 = vmatpush3.msra.mxu0 %v2934_v1  ;;  %1897 = vmatprep.mubr.msk.f32.mxu0 %vm2129_vm0, %v3233_v30 }
  0xe1   :  { %1923 = vmatpush3.msra.mxu1 %v2864_v48  ;;  %1898 = vmatmul.mubr.f32.vlgmr.msra.gmra.mxu0 %v2543_v39 }
  0xe2   :  { %1924 = vmatprep.subr.mxu1 %v3233_v30  ;;  %1935 = vmatprep.subr.mxu0 %v3233_v30 }
  0xe3   :  { %1925 = vmatpush3.msra.mxu1 %v2879_v8  ;;  %1936 = vmatpush3.msra.mxu0 %v1093_v57 }
  0xe4   :  { %1926 = vmatprep.subr.mxu1 %v3233_v30  ;;  %1937 = vmatprep.subr.mxu0 %v3233_v30 }
  0xe5   :  { %1927 = vmatpush3.msra.mxu1 %v2891_v35  ;;  %1938 = vmatpush3.msra.mxu0 %v1100_v53 }
  0xe6   :  { %1928 = vmatprep.subr.mxu1 %v3233_v30  ;;  %1939 = vmatprep.subr.mxu0 %v3233_v30 }
  0xe7   :  { %1929 = vmatpush3.msra.mxu1 %v2903_v46  ;;  %1940 = vmatpush3.msra.mxu0 %v1107_v36  ;;  %v90_v36 = vld [vmem:[#allocation8] sm:$0xff] }
  0xe8   :  { %1930 = vmatprep.subr.mxu1 %v3233_v30  ;;  %1941 = vmatprep.subr.mxu0 %v3233_v30 }
  0xe9   :  { %1931 = vmatpush3.msra.mxu1 %v2915_v29  ;;  %1932 = vmatprep.mubr.msk.f32.mxu1 %vm2129_vm0, %v3233_v30 }
  0xea   :  { %1942 = vmatpush3.msra.mxu0 %v1114_v33  ;;  %1933 = vmatmul.mubr.f32.vlgmr.msra.gmra.mxu1 %v3258_v32 }
  0xeb   :  { %1943 = vmatprep.subr.mxu0 %v3233_v30  ;;  %1970 = vmatprep.subr.mxu1 %v3233_v30 }
  0xec   :  { %1944 = vmatpush3.msra.mxu0 %v1121_v6  ;;  %1971 = vmatpush3.msra.mxu1 %v2737_v7 }
  0xed   :  { %1945 = vmatprep.subr.mxu0 %v3233_v30  ;;  %1972 = vmatprep.subr.mxu1 %v3233_v30 }
  0xee   :  { %1946 = vmatpush3.msra.mxu0 %v1128_v16  ;;  %1973 = vmatpush3.msra.mxu1 %v2745_v54 }
  0xef   :  { %1947 = vmatprep.subr.mxu0 %v3233_v30  ;;  %1974 = vmatprep.subr.mxu1 %v3233_v30 }
  0xf0   :  { %1948 = vmatpush3.msra.mxu0 %v1135_v25  ;;  %1975 = vmatpush3.msra.mxu1 %v2756_v2 }
  0xf1   :  { %1949 = vmatprep.subr.mxu0 %v3233_v30  ;;  %1976 = vmatprep.subr.mxu1 %v3233_v30 }
  0xf2   :  { %1950 = vmatpush3.msra.mxu0 %v1142_v60  ;;  %1977 = vmatpush3.msra.mxu1 %v2761_v63 }
  0xf3   :  { %1951 = vmatprep.subr.mxu0 %v3233_v30  ;;  %1978 = vmatprep.subr.mxu1 %v3233_v30 }
  0xf4   :  { %1952 = vmatpush3.msra.mxu0 %v1149_v15  ;;  %1979 = vmatpush3.msra.mxu1 %v2778_v52 }
  0xf5   :  { %1953 = vmatprep.subr.mxu0 %v3233_v30  ;;  %1980 = vmatprep.subr.mxu1 %v3233_v30 }
  0xf6   :  { %1954 = vmatpush3.msra.mxu0 %v1156_v21  ;;  %1981 = vmatpush3.msra.mxu1 %v2788_v34 }
  0xf7   :  { %1955 = vmatprep.subr.mxu0 %v3233_v30  ;;  %1982 = vmatprep.subr.mxu1 %v3233_v30 }
  0xf8   :  { %1956 = vmatpush3.msra.mxu0 %v1163_v19  ;;  %1983 = vmatpush3.msra.mxu1 %v2801_v0 }
  0xf9   :  { %1957 = vmatprep.subr.mxu0 %v3233_v30  ;;  %1984 = vmatprep.subr.mxu1 %v3233_v30 }
  0xfa   :  { %1958 = vmatpush3.msra.mxu0 %v1170_v5  ;;  %1985 = vmatpush3.msra.mxu1 %v2815_v61  ;;  %v93_v61 = vld [vmem:[#allocation9] sm:$0xff] }
  0xfb   :  { %1959 = vmatprep.subr.mxu0 %v3233_v30  ;;  %1986 = vmatprep.subr.mxu1 %v3233_v30 }
  0xfc   :  { %1960 = vmatpush3.msra.mxu0 %v1177_v13  ;;  %1987 = vmatpush3.msra.mxu1 %v2819_v9  ;;  %v91_v9 = vld [vmem:[#allocation8 + $0x8] sm:$0xff] }
  0xfd   :  { %1961 = vmatprep.subr.mxu0 %v3233_v30  ;;  %1988 = vmatprep.subr.mxu1 %v3233_v30  ;;  %v95_v13 = vld [vmem:[#allocation9 + $0x10] sm:$0xff] }
  0xfe   :  { %1962 = vmatpush3.msra.mxu0 %v1184_v28  ;;  %1989 = vmatpush3.msra.mxu1 %v2840_v12  ;;  %v94_v12 = vld [vmem:[#allocation9 + $0x8] sm:$0xff] }
  0xff   :  { %1963 = vmatprep.subr.mxu0 %v3233_v30  ;;  %1990 = vmatprep.subr.mxu1 %v3233_v30 }
 0x100   :  { %1964 = vmatpush3.msra.mxu0 %v1191_v49  ;;  %1991 = vmatpush3.msra.mxu1 %v2852_v23 }
 0x101   :  { %1965 = vmatprep.subr.mxu0 %v3233_v30  ;;  %1992 = vmatprep.subr.mxu1 %v3233_v30 }
 0x102   :  { %1966 = vmatpush3.msra.mxu0 %v1198_v27  ;;  %1967 = vmatprep.mubr.msk.f32.mxu0 %vm2129_vm0, %v3233_v30 }
 0x103   :  { %1993 = vmatpush3.msra.mxu1 %v2864_v48  ;;  %1968 = vmatmul.mubr.f32.vlgmr.msra.gmra.mxu0 %v3288_v51 }
 0x104   :  { %1994 = vmatprep.subr.mxu1 %v3233_v30  ;;  %2002 = vmatprep.mubr.msk.f32.mxu1 %vm2129_vm0, %v3233_v30 }
 0x105   :  { %1995 = vmatpush3.msra.mxu1 %v2879_v8 }
 0x106   :  { %1996 = vmatprep.subr.mxu1 %v3233_v30 }
 0x107   :  { %1997 = vmatpush3.msra.mxu1 %v2891_v35 }
 0x108   :  { %1998 = vmatprep.subr.mxu1 %v3233_v30 }
 0x109   :  { %1999 = vmatpush3.msra.mxu1 %v2903_v46 }
 0x10a   :  { %2000 = vmatprep.subr.mxu1 %v3233_v30 }
 0x10b   :  { %2001 = vmatpush3.msra.mxu1 %v2915_v29 }
 0x10c   :  { %2003 = vmatmul.mubr.f32.vlgmr.msra.gmra.mxu1 %v3288_v51 }
 0x11c   :  { %v247_v39 = vpop.f32.mrf.mxu0 }
 0x11e   :  { %v249_v32 = vpop.f32.mrf.mxu0 }
 0x122   :  { %v479_v7 = vpop.f32.mrf.mxu1 }
 0x123   :  { %v480_v22 = vadd.f32 %v479_v7, %v247_v39 }
 0x124   :  { %v481_v45 = vpop.f32.mrf.mxu1 }
 0x125   :  { %v482_v52 = vadd.f32 %v481_v45, %v249_v32 }
 0x13c   :  { %v616_v54 = vpop.f32.mrf.mxu0 }
 0x13d   :  { %v617_v57 = vadd.f32 %v616_v54, %v480_v22 }
 0x13e   :  { %v618_v2 = vpop.f32.mrf.mxu0 }
 0x13f   :  { %v619_v34 = vadd.f32 %v618_v2, %v482_v52 }
 0x144   :  { %v722_v63 = vpop.f32.mrf.mxu1 }
 0x145   :  { %v723_v53 = vadd.f32 %v722_v63, %v617_v57 }
 0x146   :  { %v724_v50 = vpop.f32.mrf.mxu1 }
 0x147   :  { %v725_v30 = vadd.f32 %v724_v50, %v619_v34 }
 0x15d   :  { %v890_v55 = vpop.f32.mrf.mxu0 }
 0x15e   :  { %v891_v0 = vadd.f32 %v890_v55, %v723_v53 }
 0x15f   :  { %v892_v24 = vpop.f32.mrf.mxu0 }
 0x160   :  { %v893_v51 = vadd.f32 %v892_v24, %v725_v30 }
 0x166   :  { %v994_v33 = vpop.f32.mrf.mxu1 }
 0x167   :  { %v995_v59 = vadd.f32 %v994_v33, %v891_v0 }
 0x168   :  { %v996_v4 = vpop.f32.mrf.mxu1 }
 0x169   :  { %v1640_v6 = vmul.f32 %v995_v59, %v90_v36  ;;  %v997_v11 = vadd.f32 %v996_v4, %v893_v51 }
 0x16b   :  { %v1643_v16 = vmul.f32 %v1640_v6, %v93_v61  ;;  %v1641_v31 = vmul.f32 %v997_v11, %v91_v9 }
 0x16d   :  { %1672 = vst [vmem:[#allocation11] sm:$0xff] %v1643_v16  ;;  %v1644_v23 = vmul.f32 %v1641_v31, %v94_v12 }
 0x16f   :  { %1673 = vst [vmem:[#allocation11 + $0x8] sm:$0xff] %v1644_v23 }
 0x180   :  { %v1086_v25 = vpop.f32.mrf.mxu0 }
 0x182   :  { %v1829_v14 = vpop.f32.mrf.mxu0 }
 0x188   :  { %v1237_v48 = vpop.f32.mrf.mxu1 }
 0x189   :  { %v1238_v35 = vadd.f32 %v1237_v48, %v1086_v25 }
 0x18a   :  { %v1864_v60 = vpop.f32.mrf.mxu1 }
 0x1a1   :  { %v1341_v42 = vpop.f32.mrf.mxu0 }
 0x1a2   :  { %v1342_v41 = vadd.f32 %v1341_v42, %v1238_v35 }
 0x1a3   :  { %v1899_v15 = vpop.f32.mrf.mxu0 }
 0x1aa   :  { %v1430_v8 = vpop.f32.mrf.mxu1 }
 0x1ab   :  { %v1431_v46 = vadd.f32 %v1430_v8, %v1342_v41 }
 0x1ac   :  { %v1934_v47 = vpop.f32.mrf.mxu1 }
 0x1c3   :  { %v1549_v21 = vpop.f32.mrf.mxu0 }
 0x1c4   :  { %v1550_v5 = vadd.f32 %v1549_v21, %v1431_v46 }
 0x1c5   :  { %v1969_v19 = vpop.f32.mrf.mxu0 }
 0x1cc   :  { %v1636_v29 = vpop.f32.mrf.mxu1 }
 0x1cd   :  { %v1637_v18 = vadd.f32 %v1636_v29, %v1550_v5 }
 0x1ce   :  { %v2004_v44 = vpop.f32.mrf.mxu1 }
 0x1cf   :  { %v1642_v1 = vmul.f32 %v1637_v18, %v92_v37 }
 0x1d1   :  { %v1645_v28 = vmul.f32 %v1642_v1, %v95_v13 }
 0x1d3   :  { %1674 = vst [vmem:[#allocation11 + $0x10] sm:$0xff] %v1645_v28 }
 0x1d4   :  { %2105 = shalt.err (!%p2102_p10)
}
 0x1d5   :  { %1685 = dma.vmem_to_hbm [thread:$0]  %s1683_s3, 512, %s3134_s4, [#allocation5]  }
 0x1d6   :  { %2120 = dma.done.wait [#allocation5], 512  }
 0x1d7   :  { %2121 = vsyncadd [#allocation5], 4294966784 }
 0x1d8   :  { %1689 = vsyncpa [#allocation4], 1 }
 0x1d9   :  { %1690 = vsyncpa [#allocation7], 1 }
 0x1da   :  { %1691 = vsyncpa [#allocation10], 1 }
 0x1db   :  { %1692 = vsyncpa [#allocation5], 1 }

</bundles_post_ra>
